<compile_context>
chip_gen: v5e
topology: v5e:2x2
jax: 0.10.0
libtpu: 0.0.40
codegen_flags: <defaults>
</compile_context>

<pallas_src>
import jax
import jax.numpy as jnp
import numpy as np
from jax.experimental import pallas as pl
from jax.experimental.pallas import tpu as pltpu


# -----------------------------------------------------------------------------
# Grouped expert MLP kernel.
# grid = (row_blocks, f_tiles); each row block belongs to exactly one expert
# (groups are padded to multiples of tm in the wrapper). f_tiles is the
# in-kernel reduction with an f32 accumulator. Unused trailing blocks skip all
# compute and emit zeros.
# -----------------------------------------------------------------------------
def _moe_gmm_kernel(block_expert_ref,       # SMEM (num_blocks,) — index_maps only
                    block_used_ref,         # SMEM (num_blocks,) — 1 if block has rows
                    x_ref,                  # (tm, H)   bf16 routed-token rows
                    w1_ref, w3_ref,         # (1, H, tf) bf16 gate / up tiles
                    w2_ref,                 # (1, tf, H) bf16 down tile
                    cw_ref,                 # (tm, 1)   f32 per-row combine weight
                    out_ref,                # (tm, H)   bf16
                    acc_ref):               # (tm, H)   f32 scratch accumulator
    del block_expert_ref
    i = pl.program_id(0)
    j = pl.program_id(1)
    last_j = pl.num_programs(1) - 1
    used = block_used_ref[i] == 1

    @pl.when(jnp.logical_and(used, j == 0))
    def _():
        acc_ref[...] = jnp.zeros_like(acc_ref)

    @pl.when(used)
    def _():
        x = x_ref[...]                                                 # bf16 (tm, H)
        g = jnp.dot(x, w1_ref[0], preferred_element_type=jnp.float32)  # (tm, tf)
        u = jnp.dot(x, w3_ref[0], preferred_element_type=jnp.float32)  # (tm, tf)
        h = ((g * jax.nn.sigmoid(g)) * u).astype(jnp.bfloat16)         # SiLU(gate)*up
        acc_ref[...] += jnp.dot(h, w2_ref[0], preferred_element_type=jnp.float32)

    @pl.when(jnp.logical_and(used, j == last_j))
    def _():
        # combine weight is a per-row scalar; scaling the final y once here is
        # equivalent to scaling h per step and cheaper.
        out_ref[...] = (acc_ref[...] * cw_ref[...]).astype(out_ref.dtype)

    @pl.when(jnp.logical_and(jnp.logical_not(used), j == last_j))
    def _():
        # never let a stale accumulator leak into an unused (pad-only) block.
        out_ref[...] = jnp.zeros_like(out_ref)


# -----------------------------------------------------------------------------
# Generation / regime aware tile selection.
# -----------------------------------------------------------------------------
def _generation_config():
    try:
        vmem_bytes = int(pltpu.get_tpu_info().vmem_capacity_bytes)
    except Exception:
        vmem_bytes = 128 * 1024 * 1024
    kind = ""
    try:
        kind = jax.devices()[0].device_kind.lower()
    except Exception:
        pass
    if vmem_bytes <= 80 * 1024 * 1024:
        # v7x-class: 64 MiB VMEM / TC, ~3.2 TB/s HBM -> compute-bound at tm~384-512.
        return {"target_tm": 512, "tf_candidates": (512, 256, 128),
                "vmem_bytes": vmem_bytes}
    if "v5 lite" in kind or "v5e" in kind:
        # v5e: 197 TF/s / 0.82 TB/s -> tm~256 already sits at the roofline.
        return {"target_tm": 256, "tf_candidates": (1024, 512, 256, 128),
                "vmem_bytes": vmem_bytes}
    # v6e default: 918 TF/s / ~1.4 TB/s -> need tm >~650 to be MXU-bound.
    return {"target_tm": 1024, "tf_candidates": (1024, 512, 256, 128),
            "vmem_bytes": vmem_bytes}


def _pick_row_tile(num_assignments, num_experts, target_tm):
    per_expert = num_assignments // max(num_experts, 1)
    if per_expert < 128:
        # decode / small batch: one row block per used expert, sublane-packed rows.
        tm = max(16, ((max(per_expert, 1) + 15) // 16) * 16)
        return int(min(tm, 128))
    # prefill: roofline-driven, MXU-aligned (multiple of 128).
    tm = min(target_tm, (per_expert // 128) * 128)
    return int(max(128, tm))


def _working_set_bytes(H, tm, tf):
    return (12 * H * tf        # 3 bf16 weight tiles, double-buffered
            + 8 * tm * H       # x + out bf16 tiles, double-buffered
            + 4 * tm * H       # f32 accumulator scratch
            + 16 * tm)         # combine-weight tiles (generous)


def _pick_tiles(num_assignments, num_experts, H, F, gen):
    tm = _pick_row_tile(num_assignments, num_experts, gen["target_tm"])
    budget = int(0.6 * gen["vmem_bytes"])
    while True:
        for tf in gen["tf_candidates"]:
            if F % tf == 0 and F > tf and _working_set_bytes(H, tm, tf) <= budget:
                return tm, tf
        if _working_set_bytes(H, tm, F) <= budget:
            return tm, F            # small F (tests) or F has no 128-aligned divisor
        if tm <= 16:
            for tf in reversed(gen["tf_candidates"]):
                if F % tf == 0 and F > tf:
                    return tm, tf
            return tm, F
        tm = max(16, tm // 2)


# -----------------------------------------------------------------------------
# Grouped expert MLP wrapper (Pallas).
# -----------------------------------------------------------------------------
def moe_experts_gmm(x_pad, w1_t, w3_t, w2_t, cw_pad, block_expert, block_used,
                    tm, tf, vmem_cap):
    R, H = x_pad.shape
    E, _, F = w1_t.shape
    num_blocks = R // tm
    num_f = F // tf

    ws = _working_set_bytes(H, tm, tf)
    vmem_limit = int(min(int(0.85 * vmem_cap),
                         max(32 * 1024 * 1024, ws + 8 * 1024 * 1024)))

    cost = pl.CostEstimate(
        flops=int(6 * R * H * F),
        transcendentals=int(R * F),
        bytes_accessed=int(num_blocks * 3 * H * F * 2 + 2 * R * H * 2 + R * 4),
    )

    return pl.pallas_call(
        _moe_gmm_kernel,
        out_shape=jax.ShapeDtypeStruct((R, H), x_pad.dtype),
        grid_spec=pltpu.PrefetchScalarGridSpec(
            num_scalar_prefetch=2,
            grid=(num_blocks, num_f),
            in_specs=[
                pl.BlockSpec((tm, H), lambda i, j, be, bu: (i, 0)),     # x rows
                # weight index_maps freeze the F index for unused blocks so
                # trailing pad blocks never re-stream an expert's weights.
                pl.BlockSpec((1, H, tf),
                             lambda i, j, be, bu: (be[i], 0, j * bu[i])),  # gate
                pl.BlockSpec((1, H, tf),
                             lambda i, j, be, bu: (be[i], 0, j * bu[i])),  # up
                pl.BlockSpec((1, tf, H),
                             lambda i, j, be, bu: (be[i], j * bu[i], 0)),  # down
                pl.BlockSpec((tm, 1), lambda i, j, be, bu: (i, 0)),     # combine w
            ],
            out_specs=pl.BlockSpec((tm, H), lambda i, j, be, bu: (i, 0)),
            scratch_shapes=[pltpu.VMEM((tm, H), jnp.float32)],
        ),
        compiler_params=pltpu.CompilerParams(
            # TODO(synk): on v7x megacore, "parallel" on the row-block axis can
            # split one expert's consecutive blocks across both TensorCores
            # (duplicate weight streams); reorder blocks per-core if DMA-bound.
            dimension_semantics=("parallel", "arbitrary"),
            vmem_limit_bytes=vmem_limit,
        ),
        cost_estimate=cost,
    )(block_expert, block_used, x_pad, w1_t, w3_t, w2_t, cw_pad)


# -----------------------------------------------------------------------------
# Full forward: router + top-k routing + group/sort/pad (XLA glue) + Pallas GMM.
# -----------------------------------------------------------------------------
def sparse_moe_block(hidden_states, params, top_k=2, tm=None, tf=None):
    B, S, H = hidden_states.shape
    x = hidden_states.reshape(-1, H)                          # (T, H) bf16
    T = x.shape[0]
    E, _, F = params["w1_t"].shape
    K = top_k
    A = T * K                                                 # number of assignments

    # ---- router (tiny; kept in XLA — a pallas_call costs more than its compute)
    logits = jnp.dot(x, params["wg_t"], preferred_element_type=jnp.float32)
    router_logits = logits.astype(jnp.bfloat16)               # (T, E)
    probs = jax.nn.softmax(router_logits.astype(jnp.float32), axis=-1)
    probs = probs.astype(jnp.bfloat16)
    topk_w, selected = jax.lax.top_k(probs, K)                # (T, K)
    rw = topk_w.astype(jnp.float32)
    rw = rw / jnp.sum(rw, axis=-1, keepdims=True)             # fp32 renormalize
    rw = rw.astype(x.dtype)                                   # back to bf16, like reference

    # ---- tile sizes (generation + regime aware)
    gen = _generation_config()
    auto_tm, auto_tf = _pick_tiles(A, E, H, F, gen)
    tm = auto_tm if tm is None else tm
    tf = auto_tf if tf is None else tf
    assert F % tf == 0 and tm % 8 == 0

    # ---- sort assignments by expert, pad each group to a multiple of tm rows
    expert_ids = selected.reshape(A).astype(jnp.int32)
    token_ids = jnp.repeat(jnp.arange(T, dtype=jnp.int32), K)
    a_weights = rw.reshape(A).astype(jnp.float32)

    order = jnp.argsort(expert_ids)
    s_expert = expert_ids[order]
    s_token = token_ids[order]
    s_weight = a_weights[order]

    counts = jnp.zeros((E,), jnp.int32).at[expert_ids].add(1)        # (E,)
    raw_start = jnp.cumsum(counts) - counts
    padded = ((counts + tm - 1) // tm) * tm
    padded_end = jnp.cumsum(padded)
    padded_start = padded_end - padded

    num_blocks = (A + E * (tm - 1)) // tm                     # static upper bound
    R = num_blocks * tm

    pos = jnp.arange(A, dtype=jnp.int32)
    dest = (padded_start[s_expert] + (pos - raw_start[s_expert])).astype(jnp.int32)

    # grouped inputs via a single gather (pad rows -> OOB index T, filled with 0)
    src_row = jnp.full((R,), T, jnp.int32).at[dest].set(s_token)
    x_pad = jnp.take(x, src_row, axis=0, mode="fill", fill_value=0)   # (R, H)
    cw_pad = jnp.zeros((R,), jnp.float32).at[dest].set(s_weight).reshape(R, 1)
    # pad rows scatter-add into dummy row T (dropped), never into a real token
    tok_pad = jnp.full((R,), T, jnp.int32).at[dest].set(s_token)

    # per-block expert id + used flag; unused trailing blocks reuse the last
    # used block's expert id (frozen weight index -> at most one extra tile DMA)
    block_starts = jnp.arange(num_blocks, dtype=jnp.int32) * tm
    raw_be = jnp.searchsorted(padded_end, block_starts, side="right").astype(jnp.int32)
    raw_be = jnp.minimum(raw_be, E - 1)
    used_rows = padded_end[-1]
    last_used = jnp.maximum(used_rows // tm - 1, 0)
    block_used = (block_starts < used_rows).astype(jnp.int32)
    block_expert = jnp.where(block_used == 1, raw_be, raw_be[last_used]).astype(jnp.int32)

    # ---- grouped expert MLP (Pallas)
    y_pad = moe_experts_gmm(x_pad, params["w1_t"], params["w3_t"], params["w2_t"],
                            cw_pad, block_expert, block_used, tm, tf,
                            gen["vmem_bytes"])                 # (R, H) bf16

    # ---- scatter-add per-assignment results back to token order (+1 dummy row)
    out = jnp.zeros((T + 1, H), jnp.float32).at[tok_pad].add(y_pad.astype(jnp.float32))
    out = out[:T]
    return out.astype(x.dtype).reshape(B, S, H), router_logits


def init_params(key, hidden_dim, ffn_dim, num_experts):
    k = jax.random.split(key, 4)
    scale = 0.02
    wg = jax.random.normal(k[0], (num_experts, hidden_dim), jnp.float32) * scale
    w1 = jax.random.normal(k[1], (num_experts, ffn_dim, hidden_dim), jnp.float32) * scale
    w2 = jax.random.normal(k[2], (num_experts, hidden_dim, ffn_dim), jnp.float32) * scale
    w3 = jax.random.normal(k[3], (num_experts, ffn_dim, hidden_dim), jnp.float32) * scale
    # pre-transpose so kernels compute x @ W directly
    return {
        "wg_t": jnp.asarray(wg.T, jnp.bfloat16),                          # (H, E)
        "w1_t": jnp.asarray(jnp.transpose(w1, (0, 2, 1)), jnp.bfloat16),  # (E, H, F)
        "w2_t": jnp.asarray(jnp.transpose(w2, (0, 2, 1)), jnp.bfloat16),  # (E, F, H)
        "w3_t": jnp.asarray(jnp.transpose(w3, (0, 2, 1)), jnp.bfloat16),  # (E, H, F)
    }


def reference(hidden_states, params, top_k=2):
    """Pure-JAX mirror of the intended MoE math (dense-over-experts)."""
    B, S, H = hidden_states.shape
    x = hidden_states.reshape(-1, H)
    E = params["w1_t"].shape[0]
    logits = jnp.dot(x, params["wg_t"], preferred_element_type=jnp.float32)
    router_logits = logits.astype(jnp.bfloat16)
    probs = jax.nn.softmax(router_logits.astype(jnp.float32), axis=-1).astype(jnp.bfloat16)
    topk_w, selected = jax.lax.top_k(probs, top_k)
    rw = topk_w.astype(jnp.float32)
    rw = rw / jnp.sum(rw, axis=-1, keepdims=True)
    rw = rw.astype(x.dtype)
    onehot = jax.nn.one_hot(selected, E, dtype=jnp.float32)
    cw = jnp.sum(onehot * rw.astype(jnp.float32)[..., None], axis=1)  # (T, E)
    acc = jnp.zeros((x.shape[0], H), jnp.float32)
    for e in range(E):
        g = jnp.dot(x, params["w1_t"][e], preferred_element_type=jnp.float32)
        u = jnp.dot(x, params["w3_t"][e], preferred_element_type=jnp.float32)
        h = ((g * jax.nn.sigmoid(g)) * u).astype(jnp.bfloat16)
        y = jnp.dot(h, params["w2_t"][e], preferred_element_type=jnp.float32)
        contrib = (y * cw[:, e:e + 1]).astype(jnp.bfloat16).astype(jnp.float32)
        acc = acc + contrib
    return acc.astype(x.dtype).reshape(B, S, H), router_logits


if __name__ == "__main__":
    batch, seq, hidden_dim, ffn_dim, num_experts, top_k = 2, 8, 32, 64, 8, 2

    key = jax.random.PRNGKey(0)
    kp, kx = jax.random.split(key)
    params = init_params(kp, hidden_dim, ffn_dim, num_experts)
    x = jax.random.normal(kx, (batch, seq, hidden_dim), jnp.float32).astype(jnp.bfloat16)

    out, router_logits = sparse_moe_block(x, params, top_k=top_k)
    out = jax.block_until_ready(out)
    router_logits = jax.block_until_ready(router_logits)

    ref_out, ref_logits = reference(x, params, top_k=top_k)
    np.testing.assert_allclose(np.asarray(out, np.float32),
                               np.asarray(ref_out, np.float32),
                               atol=2e-2, rtol=2e-2)
    np.testing.assert_allclose(np.asarray(router_logits, np.float32),
                               np.asarray(ref_logits, np.float32),
                               atol=2e-2, rtol=2e-2)

    assert out.shape == (batch, seq, hidden_dim) and out.dtype == jnp.bfloat16
    assert router_logits.shape == (batch * seq, num_experts)
    print("KERNEL_OK")
</pallas_src>

<mosaic_0001>
module attributes {stable_mosaic.version = 11 : i64} {
  func.func @_moe_gmm_kernel(%arg0: i32, %arg1: i32, %arg2: memref<9xi32, #tpu.memory_space<smem>>, %arg3: memref<9xi32, #tpu.memory_space<smem>>, %arg4: memref<16x32xbf16, #tpu.memory_space<vmem>>, %arg5: memref<1x32x64xbf16, #tpu.memory_space<vmem>>, %arg6: memref<1x32x64xbf16, #tpu.memory_space<vmem>>, %arg7: memref<1x64x32xbf16, #tpu.memory_space<vmem>>, %arg8: memref<16x1xf32, #tpu.memory_space<vmem>>, %arg9: memref<16x32xbf16, #tpu.memory_space<vmem>>, %arg10: memref<16x32xf32, #tpu.memory_space<vmem>>) attributes {dimension_semantics = [#tpu.dimension_semantics<parallel>, #tpu.dimension_semantics<arbitrary>], iteration_bounds = array<i64: 9, 1>, scalar_prefetch = 2 : i64, scratch_operands = 1 : i64, tpu.core_type = #tpu.core_type<tc>, window_params = [{transform_indices = @transform_0, window_bounds = array<i64: 16, 32>}, {transform_indices = @transform_1, window_bounds = array<i64: 1, 32, 64>}, {transform_indices = @transform_2, window_bounds = array<i64: 1, 32, 64>}, {transform_indices = @transform_3, window_bounds = array<i64: 1, 64, 32>}, {transform_indices = @transform_4, window_bounds = array<i64: 16, 1>}, {transform_indices = @transform_5, window_bounds = array<i64: 16, 32>}]} {
    %0 = arith.index_cast %arg0 : i32 to index
    %1 = memref.load %arg3[%0] : memref<9xi32, #tpu.memory_space<smem>>
    %c1_i32 = arith.constant 1 : i32
    %2 = arith.cmpi eq, %1, %c1_i32 : i32
    %c0_i32 = arith.constant 0 : i32
    %3 = arith.cmpi eq, %arg1, %c0_i32 : i32
    %4 = arith.andi %2, %3 : i1
    %5 = arith.extui %4 : i1 to i32
    %c0_i32_0 = arith.constant 0 : i32
    %6 = arith.cmpi ne, %5, %c0_i32_0 : i32
    scf.if %6 {
      %cst = arith.constant 0.000000e+00 : f32
      %18 = vector.broadcast %cst : f32 to vector<16x32xf32>
      %c0 = arith.constant 0 : index
      %c0_6 = arith.constant 0 : index
      %19 = vector.load %arg10[%c0, %c0_6] : memref<16x32xf32, #tpu.memory_space<vmem>>, vector<16x32xf32>
      tpu.vector_store %arg10[%c0, %c0_6], %18 {strides = array<i32>} : memref<16x32xf32, #tpu.memory_space<vmem>>, vector<16x32xf32>,
    } else {
    }
    %7 = arith.extui %2 : i1 to i32
    %c0_i32_1 = arith.constant 0 : i32
    %8 = arith.cmpi ne, %7, %c0_i32_1 : i32
    scf.if %8 {
      %c0 = arith.constant 0 : index
      %c0_6 = arith.constant 0 : index
      %18 = vector.load %arg4[%c0, %c0_6] : memref<16x32xbf16, #tpu.memory_space<vmem>>, vector<16x32xbf16>
      %c0_7 = arith.constant 0 : index
      %c0_8 = arith.constant 0 : index
      %c0_9 = arith.constant 0 : index
      %19 = vector.load %arg5[%c0_7, %c0_8, %c0_9] : memref<1x32x64xbf16, #tpu.memory_space<vmem>>, vector<1x32x64xbf16>
      %20 = vector.shape_cast %19 : vector<1x32x64xbf16> to vector<32x64xbf16>
      %cst = arith.constant dense<0.000000e+00> : vector<16x64xf32>
      %21 = tpu.matmul %18, %20, %cst {dimension_numbers = #tpu.dot_dimension_numbers<[1], [0], [0], [1], [0, 0, 1, 1], [], []>} : vector<16x32xbf16>, vector<32x64xbf16>, vector<16x64xf32> -> vector<16x64xf32>
      %c0_10 = arith.constant 0 : index
      %c0_11 = arith.constant 0 : index
      %c0_12 = arith.constant 0 : index
      %22 = vector.load %arg6[%c0_10, %c0_11, %c0_12] : memref<1x32x64xbf16, #tpu.memory_space<vmem>>, vector<1x32x64xbf16>
      %23 = vector.shape_cast %22 : vector<1x32x64xbf16> to vector<32x64xbf16>
      %cst_13 = arith.constant dense<0.000000e+00> : vector<16x64xf32>
      %24 = tpu.matmul %18, %23, %cst_13 {dimension_numbers = #tpu.dot_dimension_numbers<[1], [0], [0], [1], [0, 0, 1, 1], [], []>} : vector<16x32xbf16>, vector<32x64xbf16>, vector<16x64xf32> -> vector<16x64xf32>
      %25 = arith.negf %21 : vector<16x64xf32>
      %26 = math.exp %25 : vector<16x64xf32>
      %cst_14 = arith.constant 1.000000e+00 : f32
      %27 = vector.broadcast %cst_14 : f32 to vector<16x64xf32>
      %28 = arith.addf %27, %26 : vector<16x64xf32>
      %29 = arith.divf %27, %28 : vector<16x64xf32>
      %30 = arith.mulf %21, %29 : vector<16x64xf32>
      %31 = arith.mulf %30, %24 : vector<16x64xf32>
      %32 = arith.truncf %31 : vector<16x64xf32> to vector<16x64xbf16>
      %c0_15 = arith.constant 0 : index
      %c0_16 = arith.constant 0 : index
      %33 = vector.load %arg10[%c0_15, %c0_16] : memref<16x32xf32, #tpu.memory_space<vmem>>, vector<16x32xf32>
      %c0_17 = arith.constant 0 : index
      %c0_18 = arith.constant 0 : index
      %c0_19 = arith.constant 0 : index
      %34 = vector.load %arg7[%c0_17, %c0_18, %c0_19] : memref<1x64x32xbf16, #tpu.memory_space<vmem>>, vector<1x64x32xbf16>
      %35 = vector.shape_cast %34 : vector<1x64x32xbf16> to vector<64x32xbf16>
      %cst_20 = arith.constant dense<0.000000e+00> : vector<16x32xf32>
      %36 = tpu.matmul %32, %35, %cst_20 {dimension_numbers = #tpu.dot_dimension_numbers<[1], [0], [0], [1], [0, 0, 1, 1], [], []>} : vector<16x64xbf16>, vector<64x32xbf16>, vector<16x32xf32> -> vector<16x32xf32>
      %37 = arith.addf %33, %36 : vector<16x32xf32>
      %c0_21 = arith.constant 0 : index
      %c0_22 = arith.constant 0 : index
      %38 = vector.load %arg10[%c0_21, %c0_22] : memref<16x32xf32, #tpu.memory_space<vmem>>, vector<16x32xf32>
      tpu.vector_store %arg10[%c0_21, %c0_22], %37 {strides = array<i32>} : memref<16x32xf32, #tpu.memory_space<vmem>>, vector<16x32xf32>,
    } else {
    }
    %c0_i32_2 = arith.constant 0 : i32
    %9 = arith.cmpi eq, %arg1, %c0_i32_2 : i32
    %10 = arith.andi %2, %9 : i1
    %11 = arith.extui %10 : i1 to i32
    %c0_i32_3 = arith.constant 0 : i32
    %12 = arith.cmpi ne, %11, %c0_i32_3 : i32
    scf.if %12 {
      %c0 = arith.constant 0 : index
      %c0_6 = arith.constant 0 : index
      %18 = vector.load %arg10[%c0, %c0_6] : memref<16x32xf32, #tpu.memory_space<vmem>>, vector<16x32xf32>
      %c0_7 = arith.constant 0 : index
      %c0_8 = arith.constant 0 : index
      %19 = vector.load %arg8[%c0_7, %c0_8] : memref<16x1xf32, #tpu.memory_space<vmem>>, vector<16x1xf32>
      %20 = vector.broadcast %19 : vector<16x1xf32> to vector<16x32xf32>
      %21 = arith.mulf %18, %20 : vector<16x32xf32>
      %22 = arith.truncf %21 : vector<16x32xf32> to vector<16x32xbf16>
      %c0_9 = arith.constant 0 : index
      %c0_10 = arith.constant 0 : index
      %23 = vector.load %arg9[%c0_9, %c0_10] : memref<16x32xbf16, #tpu.memory_space<vmem>>, vector<16x32xbf16>
      tpu.vector_store %arg9[%c0_9, %c0_10], %22 {strides = array<i32>} : memref<16x32xbf16, #tpu.memory_space<vmem>>, vector<16x32xbf16>,
    } else {
    }
    %true = arith.constant true
    %13 = arith.xori %2, %true : i1
    %c0_i32_4 = arith.constant 0 : i32
    %14 = arith.cmpi eq, %arg1, %c0_i32_4 : i32
    %15 = arith.andi %13, %14 : i1
    %16 = arith.extui %15 : i1 to i32
    %c0_i32_5 = arith.constant 0 : i32
    %17 = arith.cmpi ne, %16, %c0_i32_5 : i32
    scf.if %17 {
      %cst = arith.constant 0.000000e+00 : bf16
      %18 = vector.broadcast %cst : bf16 to vector<16x32xbf16>
      %c0 = arith.constant 0 : index
      %c0_6 = arith.constant 0 : index
      %19 = vector.load %arg9[%c0, %c0_6] : memref<16x32xbf16, #tpu.memory_space<vmem>>, vector<16x32xbf16>
      tpu.vector_store %arg9[%c0, %c0_6], %18 {strides = array<i32>} : memref<16x32xbf16, #tpu.memory_space<vmem>>, vector<16x32xbf16>,
    } else {
    }
    return
  }
  func.func @transform_0(%arg0: i32, %arg1: i32, %arg2: memref<9xi32, #tpu.memory_space<smem>>, %arg3: memref<9xi32, #tpu.memory_space<smem>>) -> (i32, i32) {
    %c0_i32 = arith.constant 0 : i32
    %c0_i32_0 = arith.constant 0 : i32
    return %arg0, %c0_i32 : i32, i32
  }
  func.func @transform_1(%arg0: i32, %arg1: i32, %arg2: memref<9xi32, #tpu.memory_space<smem>>, %arg3: memref<9xi32, #tpu.memory_space<smem>>) -> (i32, i32, i32) {
    %0 = arith.index_cast %arg0 : i32 to index
    %1 = memref.load %arg2[%0] : memref<9xi32, #tpu.memory_space<smem>>
    %2 = arith.index_cast %arg0 : i32 to index
    %3 = memref.load %arg3[%2] : memref<9xi32, #tpu.memory_space<smem>>
    %4 = arith.muli %arg1, %3 : i32
    %c0_i32 = arith.constant 0 : i32
    %c0_i32_0 = arith.constant 0 : i32
    return %1, %c0_i32, %4 : i32, i32, i32
  }
  func.func @transform_2(%arg0: i32, %arg1: i32, %arg2: memref<9xi32, #tpu.memory_space<smem>>, %arg3: memref<9xi32, #tpu.memory_space<smem>>) -> (i32, i32, i32) {
    %0 = arith.index_cast %arg0 : i32 to index
    %1 = memref.load %arg2[%0] : memref<9xi32, #tpu.memory_space<smem>>
    %2 = arith.index_cast %arg0 : i32 to index
    %3 = memref.load %arg3[%2] : memref<9xi32, #tpu.memory_space<smem>>
    %4 = arith.muli %arg1, %3 : i32
    %c0_i32 = arith.constant 0 : i32
    %c0_i32_0 = arith.constant 0 : i32
    return %1, %c0_i32, %4 : i32, i32, i32
  }
  func.func @transform_3(%arg0: i32, %arg1: i32, %arg2: memref<9xi32, #tpu.memory_space<smem>>, %arg3: memref<9xi32, #tpu.memory_space<smem>>) -> (i32, i32, i32) {
    %0 = arith.index_cast %arg0 : i32 to index
    %1 = memref.load %arg2[%0] : memref<9xi32, #tpu.memory_space<smem>>
    %2 = arith.index_cast %arg0 : i32 to index
    %3 = memref.load %arg3[%2] : memref<9xi32, #tpu.memory_space<smem>>
    %4 = arith.muli %arg1, %3 : i32
    %c0_i32 = arith.constant 0 : i32
    %c0_i32_0 = arith.constant 0 : i32
    return %1, %4, %c0_i32 : i32, i32, i32
  }
  func.func @transform_4(%arg0: i32, %arg1: i32, %arg2: memref<9xi32, #tpu.memory_space<smem>>, %arg3: memref<9xi32, #tpu.memory_space<smem>>) -> (i32, i32) {
    %c0_i32 = arith.constant 0 : i32
    %c0_i32_0 = arith.constant 0 : i32
    return %arg0, %c0_i32 : i32, i32
  }
  func.func @transform_5(%arg0: i32, %arg1: i32, %arg2: memref<9xi32, #tpu.memory_space<smem>>, %arg3: memref<9xi32, #tpu.memory_space<smem>>) -> (i32, i32) {
    %c0_i32 = arith.constant 0 : i32
    %c0_i32_0 = arith.constant 0 : i32
    return %arg0, %c0_i32 : i32, i32
  }
}

</mosaic_0001>

<bundles_post_ra>
// kernel: tpu_custom_call.1
= control target key start
LH: loop header
LB: loop body
LE: loop exit
PB: predicated region body
PF: predicated region fallthrough
CT: control target
= control target key end

     0   :  { %s949_s30 = smov [#allocation4]   ;;  %s950_s8 = smov [#allocation5]   ;;  %s1074_s0 = inlined_call_operand.vmem [shape: s32[9], index: 0, kind: input, shape index: {}]   ;;  %s1075_s2 = inlined_call_operand.vmem [shape: bf16[144,32], index: 2, kind: input, shape index: {}]   ;;  %s1076_s3 = inlined_call_operand.vmem [shape: bf16[8,32,64], index: 3, kind: input, shape index: {}]   ;;  %s1077_s4 = inlined_call_operand.vmem [shape: bf16[8,32,64], index: 4, kind: input, shape index: {}]   ;;  %s1078_s5 = inlined_call_operand.vmem [shape: bf16[8,64,32], index: 5, kind: input, shape index: {}]   ;;  %s1079_s6 = inlined_call_operand.vmem [shape: f32[144,1], index: 6, kind: input, shape index: {}]   ;;  %s1080_s7 = inlined_call_operand.vmem [shape: bf16[144,32], index: 7, kind: output, shape index: {}]   ;;  %s1081_s1 = inlined_call_operand.vmem [shape: s32[9], index: 1, kind: input, shape index: {}]  }
   0x1   :  { %s13_s26 = sshll.u32 %s1074_s0, 4  ;;  %s18_s29 = sshll.u32 %s1081_s1, 4  ;;  %s14_s26 = int_to_ptr.vmem [resolvable:$true] %s13_s26  ;;  %s19_s29 = int_to_ptr.vmem [resolvable:$true] %s18_s29 }
   0x2   :  { %16 = dma.vmem_to_smem %s14_s26, 16, %s949_s30, [#allocation3] }
   0x3   :  { %21 = dma.vmem_to_smem %s19_s29, 16, %s950_s8, [#allocation3] }
   0x4   :  { %935 = dma.done.wait [#allocation3], 32 }
   0x5   :  { %936 = vsyncadd [#allocation3], 4294967264 }
   0x6   :  { %24 = sfence }
   0x7   :  { %s1000_s9 = smov 0   ;;  %s1002_s10 = smov 0  }
   0x8   :  { %s1004_s11 = smov 0  }
   0x9 LB: > { %s42_s0 = sadd.s32 1, %s943_s10  ;;  %p788_p0 = scmp.ge.s32.totalorder %s947_s11, 1  ;;  %s947_s11 = sphi %s1004_s11, %s30_s11   ;;  %s943_s10 = sphi %s1002_s10, %s1083_s10   ;;  %s939_s9 = sphi %s1000_s9, %s1082_s9  }
   0xa   : > { %p44_p1 = scmp.ge.s32.totalorder %s42_s0, 9  ;;  %p309_p2 = scmp.lt.s32.totalorder %s947_s11, 10 }
   0xc   : > { %s1085_s0 = smov (%p44_p1, %s42_s0), 0  ;;  %p310_p3 = pnand %p788_p0, %p309_p2 }
   0xd   : > { %s789_s1 = sshll.u32 (!%p310_p3), %s939_s9, 1  ;;  %s382_s12 = sld [smem:[#allocation4 + %s939_s9]] (!%p310_p3) }
   0xe   : > { %313 = sbr.rel (%p310_p3) target bundleno = 495 (0x1ef), region = 40  ;;  %p377_p4 = scmp.lt.s32.totalorder (!%p310_p3), %s789_s1, 17 }
   0xf   : > { %s396_s13 = sld [smem:[#allocation4 + %s939_s9]] (!%p310_p3) }
  0x10   : > { %s410_s14 = sld [smem:[#allocation4 + %s939_s9]] (!%p310_p3) }
  0x11   : > { %s1018_s15 = sld [smem:[#allocation5 + %s939_s9]] (!%p310_p3) }
  0x13   : > { %s1087_s1 = smov (!%p377_p4, %s789_s1), 17  ;;  %p385_p5 = scmp.lt.s32.totalorder %s382_s12, 7 }
  0x14   : > { %s790_s16 = sshll.u32 %s1087_s1, 2  ;;  %s798_s17 = sshll.u32 %s1087_s1, 3 }
  0x15   : > { %s1023_s20 = scalar_lea.vmem %s1075_s2, %s790_s16  ;;  %p399_p6 = scmp.lt.s32.totalorder %s396_s13, 7 }
  0x16   : > { %s1028_s23 = scalar_lea.vmem %s1079_s6, %s798_s17  ;;  %s1089_s12 = smov (!%p385_p5, %s382_s12), 7 }
  0x17   : > { %s1091_s13 = smov (!%p399_p6, %s396_s13), 7  ;;  %s847_s24 = sshll.u32 %s1089_s12, 4 }
  0x18   : > { %p414_p7 = scmp.lt.s32.totalorder %s410_s14, 7  ;;  %s392_s27 = scalar_lea.vmem %s1076_s3, %s847_s24 }
  0x19   : > { %s848_s28 = sshll.u32 %s1091_s13, 4  ;;  %s1039_s18 = scalar_lea.vmem %s1080_s7, %s790_s16 }
  0x1a   : > { %s406_s8 = scalar_lea.vmem %s1077_s4, %s848_s28  ;;  %s1093_s14 = smov (!%p414_p7, %s410_s14), 7 }
  0x1b   : > { %p440_p8 = scmp.eq.s32.totalorder %s1018_s15, 1  ;;  %s849_s17 = sshll.u32 %s1093_s14, 5 }
  0x1c   : > { %s421_s21 = scalar_lea.vmem %s1078_s5, %s849_s17  ;;  %vm446_vm0 = vcmask (%p440_p8), 261120   ;;  %v951_v0 = vmov (%p440_p8), 0.0  }
  0x1d   : > { %445 = sbr.rel (!%p440_p8) target bundleno = 34 (0x22), region = 44  ;;  %447 = vst.msk [vmem:[#allocation2] sm:$0xff] (%p440_p8), %vm446_vm0, %v951_v0 }
  0x1e   : > { %448 = vst.msk [vmem:[#allocation2 + $0x8] sm:$0xff] (%p440_p8), %vm446_vm0, %v951_v0 }
  0x22 PF: > { %p802_p9 = scmp.ne.s32.totalorder %s1018_s15, 1 }
  0x24   : > { %451 = sbr.rel (%p802_p9) target bundleno = 360 (0x168), region = 48 }
  0x29   : > { %v853_v1 = vld [vmem:[%s392_s27 + $0x8] sm:$0xff]  ;;  %v852_v3 = vld [vmem:[%s392_s27] sm:$0xff]  ;;  %vm475_vm1 = vcmask 261120   ;;  %v859_v6 = vld [vmem:[%s421_s21 + $0x18] sm:$0xff]  ;;  %vm600_vm10 = vcmask 523264  }
  0x2a   : > { %v855_v2 = vld [vmem:[%s406_s8 + $0x8] sm:$0xff]  ;;  %485 = vmatpush.bf16.msra.mxu0 %v853_v1  ;;  %v854_v4 = vld [vmem:[%s406_s8] sm:$0xff]  ;;  %608 = vmatpush.bf16.msra.mxu2 %v859_v6  ;;  %v858_v7 = vld [vmem:[%s421_s21 + $0x10] sm:$0xff] }
  0x2b   : > { %515 = vmatpush.bf16.msra.mxu1 %v855_v2  ;;  %v851_v5 = vld [vmem:[%s1023_s20] sm:$0xff]  ;;  %v857_v10 = vld [vmem:[%s421_s21 + $0x8] sm:$0xff] }
  0x2c   : > { %v856_v11 = vld [vmem:[%s421_s21] sm:$0xff]  ;;  %v567_v48 = vld [vmem:[#allocation2 + $0x8] sm:$0xff] }
  0x2d   : > { %v566_v45 = vld [vmem:[#allocation2] sm:$0xff] }
  0x2e   : > { %486 = vmatpush.bf16.msra.mxu0 %v852_v3  ;;  %609 = vmatpush.bf16.msra.mxu2 %v858_v7 }
  0x2f   : > { %516 = vmatpush.bf16.msra.mxu1 %v854_v4 }
  0x31   : > { %815 = vmatmul.msk.bf16.vlgmr.msra.gmra.mxu0 %vm475_vm1, %v851_v5 }
  0x32   : > { %824 = vmatmul.msk.bf16.vlgmr.msra.gmra.mxu1 %vm475_vm1, %v851_v5  ;;  %610 = vmatpush.bf16.msra.mxu2 %v857_v10 }
  0x36   : > { %611 = vmatpush.bf16.msra.mxu2 %v856_v11 }
  0xae   : > { %v488_v8 = vpop.f32.mrf.mxu0 }
  0xaf   : > { %v825_v9 = vmul.f32 -1.442695, %v488_v8  ;;  %v518_v27 = vpop.f32.mrf.mxu1 }
  0xb1   : > { %890 = vpow2.f32 %v825_v9 }
  0xb6   : > { %v490_v12 = vpop.f32.mrf.mxu0 }
  0xb7   : > { %v891_v13 = vpop.eup %890  ;;  %v826_v14 = vmul.f32 -1.442695, %v490_v12  ;;  %v520_v41 = vpop.f32.mrf.mxu1 }
  0xb8   : > { %v529_v15 = vadd.f32 1.0, %v891_v13 }
  0xb9   : > { %892 = vpow2.f32 %v826_v14 }
  0xba   : > { %894 = vrcp.f32 %v529_v15  ;;  %v542_v24 = vand.u32 2147483648, %v529_v15  ;;  %vm536_vm3 = vweird.f32 %v529_v15  ;;  %v540_v25 = vand.u32 2147483647, %v529_v15 }
  0xbc   : > { %v543_v30 = vor.u32 1.1754944e-38, %v542_v24  ;;  %vm541_vm5 = vcmp.eq.f32.partialorder %v540_v25, 8.507059e+37 }
  0xbf   : > { %v893_v16 = vpop.eup %892 }
  0xc0   : > { %v895_v17 = vpop.eup %894  ;;  %v530_v18 = vadd.f32 1.0, %v893_v16 }
  0xc1   : > { %v532_v19 = vmul.f32 %v895_v17, %v529_v15  ;;  %vm537_vm2 = vweird.f32 %v895_v17 }
  0xc2   : > { %896 = vrcp.f32 %v530_v18  ;;  %vm538_vm4 = vmor %vm536_vm3, %vm537_vm2  ;;  %v557_v31 = vand.u32 2147483648, %v530_v18  ;;  %v555_v33 = vand.u32 2147483647, %v530_v18  ;;  %vm551_vm7 = vweird.f32 %v530_v18 }
  0xc3   : > { %v533_v20 = vsub.f32 1.0, %v532_v19 }
  0xc4   : > { %v558_v36 = vor.u32 1.1754944e-38, %v557_v31  ;;  %vm556_vm9 = vcmp.eq.f32.partialorder %v555_v33, 8.507059e+37 }
  0xc5   : > { %v534_v21 = vmul.f32 %v895_v17, %v533_v20 }
  0xc7   : > { %v535_v22 = vadd.f32 %v895_v17, %v534_v21 }
  0xc8   : > { %v897_v23 = vpop.eup %896 }
  0xc9   : > { %v547_v26 = vmul.f32 %v897_v23, %v530_v18  ;;  %v539_v28 = vsel %vm538_vm4, %v895_v17, %v535_v22  ;;  %vm552_vm6 = vweird.f32 %v897_v23 }
  0xca   : > { %v544_v34 = vsel %vm541_vm5, %v543_v30, %v539_v28  ;;  %vm553_vm8 = vmor %vm551_vm7, %vm552_vm6 }
  0xcb   : > { %v548_v29 = vsub.f32 1.0, %v547_v26  ;;  %v561_v37 = vmul.f32 %v544_v34, %v488_v8 }
  0xcd   : > { %v549_v32 = vmul.f32 %v897_v23, %v548_v29  ;;  %v563_v42 = vmul.f32 %v561_v37, %v518_v27 }
  0xcf   : > { %v550_v35 = vadd.f32 %v897_v23, %v549_v32 }
  0xd1   : > { %v554_v38 = vsel %vm553_vm8, %v897_v23, %v550_v35 }
  0xd2   : > { %v559_v39 = vsel %vm556_vm9, %v558_v36, %v554_v38 }
  0xd3   : > { %v562_v40 = vmul.f32 %v559_v39, %v490_v12 }
  0xd5   : > { %v564_v43 = vmul.f32 %v562_v40, %v520_v41 }
  0xd7   : > { %v565_v44 = vpack.c.bf16 %v564_v43, %v563_v42 }
  0xd9   : > { %843 = vmatmul.msk.bf16.vlgmr.msra.gmra.mxu2 %vm600_vm10, %v565_v44 }
 0x15c   : > { %v613_v46 = vpop.f32.mrf.mxu2 }
 0x15d   : > { %v618_v47 = vadd.f32 %v613_v46, %v566_v45 }
 0x15f   : > { %620 = vst.msk [vmem:[#allocation2] sm:$0xff] %vm475_vm1, %v618_v47 }
 0x164   : > { %v615_v49 = vpop.f32.mrf.mxu2 }
 0x165   : > { %v619_v50 = vadd.f32 %v615_v49, %v567_v48 }
 0x167   : > { %621 = vst.msk [vmem:[#allocation2 + $0x8] sm:$0xff] %vm475_vm1, %v619_v50 }
 0x168 PF: > { %623 = sbr.rel (!%p440_p8) target bundleno = 490 (0x1ea), region = 52  ;;  %v626_v51 = vld [vmem:[%s1028_s23] sm:$0xff] (%p440_p8)  ;;  %v952_v52 = vmov (%p440_p8), 0   ;;  %v627_v53 = vld [vmem:[%s1028_s23 + $0x8] sm:$0xff] (%p440_p8)  ;;  %vm642_vm11 = vcmask (%p440_p8), 257024  }
 0x169   : > { %898 = vset.pattern.permute.xlu0 (%p440_p8), %v952_v52  ;;  %v624_v54 = vld [vmem:[#allocation2] sm:$0xff] (%p440_p8) }
 0x16a   : > { %630 = vperm.xlu0 (%p440_p8), %898, %v626_v51  }
 0x16e   : > { %v625_v58 = vld [vmem:[#allocation2 + $0x8] sm:$0xff] }
 0x172   : > { %635 = vperm.xlu0 %898, %v627_v53  }
 0x1dc   : > { %v631_v55 = vpop.permute.xlu0 %630 }
 0x1dd   : > { %v638_v56 = vmul.f32 %v631_v55, %v624_v54 }
 0x1df   : > { %v640_v57 = vpack.c.bf16 %v638_v56, %v638_v56 }
 0x1e1   : > { %643 = vst.msk [vmem:[%s1039_s18] sm:$0xf] %vm642_vm11, %v640_v57 }
 0x1e4   : > { %v636_v59 = vpop.permute.xlu0 %635 }
 0x1e5   : > { %v639_v60 = vmul.f32 %v636_v59, %v625_v58 }
 0x1e7   : > { %v641_v61 = vpack.c.bf16 %v639_v60, %v639_v60 }
 0x1e9   : > { %644 = vst.msk [vmem:[%s1039_s18 + $0x4] sm:$0xf] %vm642_vm11, %v641_v61 }
 0x1ea PF: > { %649 = sbr.rel (!%p802_p9) target bundleno = 495 (0x1ef), region = 56  ;;  %vm650_vm12 = vcmask (%p802_p9), 257024   ;;  %v953_v62 = vmov (%p802_p9), 0  }
 0x1eb   : > { %651 = vst.msk [vmem:[%s1039_s18] sm:$0xf] (%p802_p9), %vm650_vm12, %v953_v62 }
 0x1ec   : > { %652 = vst.msk [vmem:[%s1039_s18 + $0x4] sm:$0xf] (%p802_p9), %vm650_vm12, %v953_v62 }
 0x1ef PF: > { %s30_s11 = sadd.s32 1, %s947_s11   ;;  %s1082_s9 = smov %s943_s10 }
 0x1f0   : > { %p27_p10 = scmp.ge.s32.totalorder %s30_s11, 11   ;;  %s1083_s10 = smov %s1085_s0 }
 0x1f2   :  { %29 = sbr.rel (!%p27_p10) target bundleno = 9 (0x9), region = 98 }

</bundles_post_ra>
